<compile_context>
chip_gen: v7x
topology: tpu7x:2x2x1
jax: 0.10.0
libtpu: 0.0.40
codegen_flags: <defaults>
</compile_context>

<pallas_src>
import numpy as np
import jax
import jax.numpy as jnp
from jax import lax
from jax.experimental import pallas as pl
from jax.experimental.pallas import tpu as pltpu

EPS = 1e-7
_PI_F32 = float(np.float32(np.pi))

# ------------------------- in-kernel acos (clamped domain) -------------------------
# Abramowitz & Stegun 4.4.46: acos(x) ~= sqrt(1-x) * poly(x) on [0,1], |err| <= 2e-8.
_ACOS_COEFFS = (1.5707963050, -0.2145988016, 0.0889789874, -0.0501743046,
                0.0308918810, -0.0170881256, 0.0066700901, -0.0012624911)


def _acos_clamped(x):
    # x already clamped to [-1+EPS, 1-EPS] -> acos_safe reduces to plain acos.
    # sqrt goes to the EUP, the polynomial to the VPU: free filler in a
    # memory-bound kernel on all three generations.
    ax = jnp.abs(x)
    p = jnp.float32(_ACOS_COEFFS[-1])
    for c in _ACOS_COEFFS[-2::-1]:
        p = p * ax + jnp.float32(c)
    r = lax.sqrt(jnp.maximum(1.0 - ax, 0.0)) * p
    return jnp.where(x >= 0, r, _PI_F32 - r)


# ------------------------- Kernel 1: normalize + dot + acos -------------------------
def _theta_kernel(yhat_ref, y_ref, theta_ref):
    # Upcast right after load so bf16 inputs (halved HBM read traffic) still do
    # the clamp/acos-sensitive math in f32 (required on v5e anyway: no bf16 VPU).
    yh = yhat_ref[0].astype(jnp.float32)                  # (C, TN)
    yv = y_ref[0].astype(jnp.float32)                     # (C, TN)
    ss = jnp.sum(yh * yh, axis=0, keepdims=True)          # (1, TN)  ||y_hat||^2
    sd = jnp.sum(yh * yv, axis=0, keepdims=True)          # (1, TN)  <y_hat, y>
    dp = sd * lax.rsqrt(ss)                               # fused normalize+dot
    dp = jnp.clip(dp, -1.0 + EPS, 1.0 - EPS)              # dotprod_clamp
    theta_ref[0] = _acos_clamped(dp)                      # fused acos_safe


def _choose_tile_n(n, c, itemsize):
    # VMEM per grid step: 2 inputs x 2 bufs x C x tn x itemsize  (inputs)
    #                   + 2 bufs x tn x 4B                      (f32 output)
    # Budget ~16 MiB keeps us well under the 32 MiB scoped default (v7x incl.).
    budget = 16 << 20
    per_lane = 4 * c * itemsize + 2 * 4
    tn = min(budget // per_lane, 262144)
    if n <= tn:
        return n                       # full row: block dim == array dim is legal
    return max(128, (tn // 128) * 128)  # lane tile, multiple of 128; ragged edge via cdiv


def compute_theta(y_hat, y):
    B, C, N = y_hat.shape
    tn = _choose_tile_n(N, C, y_hat.dtype.itemsize)
    bytes_acc = 2 * B * C * N * y_hat.dtype.itemsize + B * N * 4
    return pl.pallas_call(
        _theta_kernel,
        out_shape=jax.ShapeDtypeStruct((B, 1, N), jnp.float32),
        grid=(B, pl.cdiv(N, tn)),
        in_specs=[
            pl.BlockSpec((1, C, tn), lambda b, n: (b, 0, n)),
            pl.BlockSpec((1, C, tn), lambda b, n: (b, 0, n)),
        ],
        out_specs=pl.BlockSpec((1, 1, tn), lambda b, n: (b, 0, n)),
        compiler_params=pltpu.CompilerParams(
            dimension_semantics=("parallel", "parallel")),
        cost_estimate=pl.CostEstimate(
            flops=int((4 * C + 12) * B * N),
            transcendentals=int(2 * B * N),          # rsqrt + sqrt per pixel
            bytes_accessed=int(bytes_acc)),
    )(y_hat, y)


# -------------- Kernel 2: per-row selection + masked sum (grid over batch) ---------
def _f32_bits(x):
    return int(np.float32(x).view(np.int32))


# theta is in [acos(1-EPS), acos(-1+EPS)] ~ [4.9e-4, pi - 4.9e-4]; tighten the
# bisection range to [bits(1e-4), bits(pi)+1] -> 27 passes instead of 32.
_THETA_LO_BITS = _f32_bits(1e-4)
_THETA_HI_BITS = _f32_bits(np.pi) + 1
_BISECT_ITERS = int(np.ceil(np.log2(_THETA_HI_BITS - _THETA_LO_BITS)))   # == 27


def _make_select_sum_kernel(pid, thresh):
    cnt_target = int(pid) + 1
    pid_f = float(pid)
    thresh_f = float(thresh)

    def _kernel(theta_ref, out_ref):
        th = theta_ref[0]                              # (S, M) f32, one batch row
        # theta > 0 -> int32 bit patterns are order-isomorphic to float values
        # (NaNs from ||y_hat||=0 sort past bits(pi)+1 and fall into the s2 branch,
        #  matching the sort-based reference).
        bits = pltpu.bitcast(th, jnp.int32)            # (S, M) i32

        def body(_, carry):
            lo, hi = carry                             # (1,1) i32 each
            mid = lo + ((hi - lo) >> 1)
            # int32 count: exact for any N (no 2^24 f32 ceiling).
            cnt = jnp.sum((bits <= mid).astype(jnp.int32))
            ge = cnt >= cnt_target
            return jnp.where(ge, lo, mid + 1), jnp.where(ge, mid, hi)

        lo0 = jnp.full((1, 1), _THETA_LO_BITS, dtype=jnp.int32)
        hi0 = jnp.full((1, 1), _THETA_HI_BITS, dtype=jnp.int32)
        lo, _ = lax.fori_loop(0, _BISECT_ITERS, body, (lo0, hi0))
        # lo is bitwise-exactly the pid-th sorted theta of this row.
        vp = pltpu.bitcast(lo, jnp.float32)            # (1, 1)

        lt_vp = th < vp                                # (S, M)
        s1 = jnp.sum(jnp.where(lt_vp, th, 0.0))                       # sum(theta < vp)
        c1 = jnp.sum(lt_vp.astype(jnp.int32)).astype(jnp.float32)     # count(theta < vp)
        s2 = jnp.sum(jnp.where(th < thresh_f, th, 0.0))               # sum(theta < thresh)
        res = jnp.where(vp < thresh_f, s1 + vp * (pid_f - c1), s2)    # (1, 1)
        out_ref[0] = res

    return _kernel


def select_and_sum(theta_packed, pid, thresh):
    # grid=(B,): one sublane-packed row per step -> VMEM bounded by ~2*N*4B,
    # both v7x TensorCores get work, and the HBM fetch of row b+1 pipelines
    # under the 27-pass search on row b.
    # TODO(synk): for extremely large rows (N*4B approaching the VMEM limit),
    # stream pixel chunks per bisection pass instead of one (S, N//S) block.
    B, S, M = theta_packed.shape
    N = S * M
    out = pl.pallas_call(
        _make_select_sum_kernel(pid, thresh),
        out_shape=jax.ShapeDtypeStruct((B, 1, 1), jnp.float32),
        grid=(B,),
        in_specs=[pl.BlockSpec((1, S, M), lambda b: (b, 0, 0))],
        out_specs=pl.BlockSpec((1, 1, 1), lambda b: (b, 0, 0)),
        compiler_params=pltpu.CompilerParams(
            dimension_semantics=("parallel",)),
        cost_estimate=pl.CostEstimate(
            flops=int((2 * _BISECT_ITERS + 8) * B * N),
            transcendentals=0,
            bytes_accessed=int(B * N * 4 + B * 4)),
    )(theta_packed)
    return jnp.sum(out)


# ------------------------------------ Wrapper -------------------------------------
def epipolar_loss(y_hat, y, percentile, thresh, compute_dtype=None):
    """y_hat, y: (B, C, H, W), NCHW like the PyTorch module.

    compute_dtype: optional I/O dtype for kernel 1 (e.g. jnp.bfloat16 halves the
    dominant HBM read traffic; math stays f32 in-kernel). Defaults to the input
    dtype (f32 inputs stay f32 -> bitwise-faithful to the reference).
    """
    B, C, H, W = y_hat.shape
    N = H * W
    if compute_dtype is None:
        compute_dtype = (jnp.bfloat16 if y_hat.dtype == jnp.bfloat16 else jnp.float32)
    yh = y_hat.reshape(B, C, N).astype(compute_dtype)
    yv = y.reshape(B, C, N).astype(compute_dtype)

    theta = compute_theta(yh, yv)                 # (B, 1, N) f32, acos fused in-kernel

    pid = int(N * percentile)
    # Sublane-pack each row so kernel 2's bisection runs on full vregs even at
    # small batch; the reshape is a trivial row-major re-view of the same bytes.
    S = 8 if N % 8 == 0 else 1
    theta_packed = theta.reshape(B, S, N // S)
    return select_and_sum(theta_packed, pid, thresh)


# ------------------------------- NumPy reference ----------------------------------
def reference_loss(y_hat, y, percentile, thresh):
    y_hat = np.asarray(y_hat, np.float32)
    y = np.asarray(y, np.float32)
    mag = np.sqrt(np.sum(y_hat * y_hat, axis=1, keepdims=True))
    y_norm = y_hat / mag
    dp = np.sum(y_norm * y, axis=1, keepdims=True)
    dp = np.clip(dp, -1.0 + EPS, 1.0 - EPS)
    theta = np.arccos(dp)
    B = y.shape[0]
    ts = theta.reshape(B, -1)
    order = np.argsort(ts, axis=1, kind="stable")
    vals = np.take_along_axis(ts, order, axis=1)
    pid = int(ts.shape[1] * percentile)
    total = 0.0
    for i in range(B):
        if vals[i, pid] < thresh:
            sel = order[i, :pid]
        else:
            sel = order[i, vals[i] < thresh]
        total += ts[i, sel].sum()
    return float(total)


# -------------------------------------- Main --------------------------------------
if __name__ == "__main__":
    B, C, H, W = 2, 4, 16, 16
    percentile, thresh = 0.5, 1.0

    key = jax.random.PRNGKey(0)
    k1, k2 = jax.random.split(key)
    y_hat = jax.random.normal(k1, (B, C, H, W), dtype=jnp.float32)
    y_raw = jax.random.normal(k2, (B, C, H, W), dtype=jnp.float32)
    # normalize y so the dot product behaves like a cosine (typical epipolar usage)
    y = y_raw / jnp.sqrt(jnp.sum(y_raw * y_raw, axis=1, keepdims=True))

    loss = epipolar_loss(y_hat, y, percentile, thresh)
    loss = jax.block_until_ready(loss)

    ref = reference_loss(np.asarray(y_hat), np.asarray(y), percentile, thresh)
    np.testing.assert_allclose(float(loss), ref, rtol=1e-3, atol=1e-2)

    print("KERNEL_OK")
</pallas_src>

<mosaic_0001>
module attributes {stable_mosaic.version = 11 : i64} {
  func.func @_theta_kernel(%arg0: i32, %arg1: i32, %arg2: memref<1x4x256xf32, #tpu.memory_space<vmem>>, %arg3: memref<1x4x256xf32, #tpu.memory_space<vmem>>, %arg4: memref<1x1x256xf32, #tpu.memory_space<vmem>>) attributes {dimension_semantics = [#tpu.dimension_semantics<parallel>, #tpu.dimension_semantics<parallel>], iteration_bounds = array<i64: 2, 1>, scalar_prefetch = 0 : i64, scratch_operands = 0 : i64, tpu.core_type = #tpu.core_type<tc>, window_params = [{transform_indices = @transform_0, window_bounds = array<i64: 1, 4, 256>}, {transform_indices = @transform_1, window_bounds = array<i64: 1, 4, 256>}, {transform_indices = @transform_2, window_bounds = array<i64: 1, 1, 256>}]} {
    %c0 = arith.constant 0 : index
    %c0_0 = arith.constant 0 : index
    %c0_1 = arith.constant 0 : index
    %0 = vector.load %arg2[%c0, %c0_0, %c0_1] : memref<1x4x256xf32, #tpu.memory_space<vmem>>, vector<1x4x256xf32>
    %1 = vector.shape_cast %0 : vector<1x4x256xf32> to vector<4x256xf32>
    %c0_2 = arith.constant 0 : index
    %c0_3 = arith.constant 0 : index
    %c0_4 = arith.constant 0 : index
    %2 = vector.load %arg3[%c0_2, %c0_3, %c0_4] : memref<1x4x256xf32, #tpu.memory_space<vmem>>, vector<1x4x256xf32>
    %3 = vector.shape_cast %2 : vector<1x4x256xf32> to vector<4x256xf32>
    %4 = arith.mulf %1, %1 : vector<4x256xf32>
    %cst = arith.constant dense<0.000000e+00> : vector<256xf32>
    %5 = vector.multi_reduction <add>, %4, %cst [0] : vector<4x256xf32> to vector<256xf32>
    %6 = vector.shape_cast %5 : vector<256xf32> to vector<1x256xf32>
    %7 = arith.mulf %1, %3 : vector<4x256xf32>
    %cst_5 = arith.constant dense<0.000000e+00> : vector<256xf32>
    %8 = vector.multi_reduction <add>, %7, %cst_5 [0] : vector<4x256xf32> to vector<256xf32>
    %9 = vector.shape_cast %8 : vector<256xf32> to vector<1x256xf32>
    %10 = math.rsqrt %6 : vector<1x256xf32>
    %11 = arith.mulf %9, %10 : vector<1x256xf32>
    %cst_6 = arith.constant -0.99999988 : f32
    %cst_7 = arith.constant 0.99999988 : f32
    %12 = vector.broadcast %cst_6 : f32 to vector<1x256xf32>
    %13 = arith.maximumf %12, %11 : vector<1x256xf32>
    %14 = vector.broadcast %cst_7 : f32 to vector<1x256xf32>
    %15 = arith.minimumf %14, %13 : vector<1x256xf32>
    %16 = math.absf %15 : vector<1x256xf32>
    %cst_8 = arith.constant -0.0012624911 : f32
    %17 = vector.broadcast %cst_8 : f32 to vector<1x256xf32>
    %18 = arith.mulf %17, %16 : vector<1x256xf32>
    %cst_9 = arith.constant 6.670090e-03 : f32
    %19 = vector.broadcast %cst_9 : f32 to vector<1x256xf32>
    %20 = arith.addf %18, %19 : vector<1x256xf32>
    %21 = arith.mulf %20, %16 : vector<1x256xf32>
    %cst_10 = arith.constant -0.0170881264 : f32
    %22 = vector.broadcast %cst_10 : f32 to vector<1x256xf32>
    %23 = arith.addf %21, %22 : vector<1x256xf32>
    %24 = arith.mulf %23, %16 : vector<1x256xf32>
    %cst_11 = arith.constant 0.0308918804 : f32
    %25 = vector.broadcast %cst_11 : f32 to vector<1x256xf32>
    %26 = arith.addf %24, %25 : vector<1x256xf32>
    %27 = arith.mulf %26, %16 : vector<1x256xf32>
    %cst_12 = arith.constant -0.0501743034 : f32
    %28 = vector.broadcast %cst_12 : f32 to vector<1x256xf32>
    %29 = arith.addf %27, %28 : vector<1x256xf32>
    %30 = arith.mulf %29, %16 : vector<1x256xf32>
    %cst_13 = arith.constant 0.0889789909 : f32
    %31 = vector.broadcast %cst_13 : f32 to vector<1x256xf32>
    %32 = arith.addf %30, %31 : vector<1x256xf32>
    %33 = arith.mulf %32, %16 : vector<1x256xf32>
    %cst_14 = arith.constant -0.214598805 : f32
    %34 = vector.broadcast %cst_14 : f32 to vector<1x256xf32>
    %35 = arith.addf %33, %34 : vector<1x256xf32>
    %36 = arith.mulf %35, %16 : vector<1x256xf32>
    %cst_15 = arith.constant 1.57079625 : f32
    %37 = vector.broadcast %cst_15 : f32 to vector<1x256xf32>
    %38 = arith.addf %36, %37 : vector<1x256xf32>
    %cst_16 = arith.constant 1.000000e+00 : f32
    %39 = vector.broadcast %cst_16 : f32 to vector<1x256xf32>
    %40 = arith.subf %39, %16 : vector<1x256xf32>
    %cst_17 = arith.constant 0.000000e+00 : f32
    %41 = vector.broadcast %cst_17 : f32 to vector<1x256xf32>
    %42 = arith.maximumf %40, %41 : vector<1x256xf32>
    %43 = math.sqrt %42 : vector<1x256xf32>
    %44 = arith.mulf %43, %38 : vector<1x256xf32>
    %cst_18 = arith.constant 0.000000e+00 : f32
    %45 = vector.broadcast %cst_18 : f32 to vector<1x256xf32>
    %46 = arith.cmpf oge, %15, %45 : vector<1x256xf32>
    %cst_19 = arith.constant 3.14159274 : f32
    %47 = vector.broadcast %cst_19 : f32 to vector<1x256xf32>
    %48 = arith.subf %47, %44 : vector<1x256xf32>
    %49 = arith.select %46, %44, %48 : vector<1x256xi1>, vector<1x256xf32>
    %c0_20 = arith.constant 0 : index
    %c0_21 = arith.constant 0 : index
    %c0_22 = arith.constant 0 : index
    %50 = vector.load %arg4[%c0_20, %c0_21, %c0_22] : memref<1x1x256xf32, #tpu.memory_space<vmem>>, vector<1x1x256xf32>
    %51 = vector.shape_cast %50 : vector<1x1x256xf32> to vector<1x256xf32>
    %52 = vector.shape_cast %49 : vector<1x256xf32> to vector<1x1x256xf32>
    tpu.vector_store %arg4[%c0_20, %c0_21, %c0_22], %52 {strides = array<i32>} : memref<1x1x256xf32, #tpu.memory_space<vmem>>, vector<1x1x256xf32>,
    return
  }
  func.func @transform_0(%arg0: i32, %arg1: i32) -> (i32, i32, i32) {
    %c0_i32 = arith.constant 0 : i32
    %c0_i32_0 = arith.constant 0 : i32
    return %arg0, %c0_i32, %arg1 : i32, i32, i32
  }
  func.func @transform_1(%arg0: i32, %arg1: i32) -> (i32, i32, i32) {
    %c0_i32 = arith.constant 0 : i32
    %c0_i32_0 = arith.constant 0 : i32
    return %arg0, %c0_i32, %arg1 : i32, i32, i32
  }
  func.func @transform_2(%arg0: i32, %arg1: i32) -> (i32, i32, i32) {
    %c0_i32 = arith.constant 0 : i32
    %c0_i32_0 = arith.constant 0 : i32
    return %arg0, %c0_i32, %arg1 : i32, i32, i32
  }
}

</mosaic_0001>

<bundles_post_ra>
// kernel: tpu_custom_call.1
= control target key start
LH: loop header
LB: loop body
LE: loop exit
PB: predicated region body
PF: predicated region fallthrough
CT: control target
= control target key end

     0   :  { %7 = vsyncpa [#allocation3], 0  ;;  %s967_s0 = inlined_call_operand.hbm [shape: f32[2,4,256], index: 0, kind: input, shape index: {}]   ;;  %s968_s1 = inlined_call_operand.hbm [shape: f32[2,4,256], index: 1, kind: input, shape index: {}]   ;;  %s969_s2 = inlined_call_operand.hbm [shape: f32[2,1,256], index: 2, kind: output, shape index: {}]  }
   0x1   :  { %9 = vsyncpa [#allocation3 + $0x1], 0 }
   0x2   :  { %10 = vsyncpa [#allocation6], 0 }
   0x3   :  { %12 = vsyncpa [#allocation6 + $0x1], 0 }
   0x4   :  { %13 = vsyncpa [#allocation4], 0 }
   0x5   :  { %15 = vsyncpa [#allocation4 + $0x1], 0  ;;  %s743_s9 = smov 0   ;;  %s745_s10 = smov 0  }
   0x6   :  { %s747_s11 = smov 0   ;;  %s749_s12 = smov 0  }
   0x7   :  { %s751_s13 = smov 0   ;;  %s753_s14 = smov 0  }
   0x8 LB: > { %s476_s15 = sadd.s32 4294967295, %s722_s14   ;;  %s477_s16 = sadd.s32 4294967294, %s722_s14   ;;  %s722_s14 = sphi %s753_s14, %s21_s14   ;;  %s718_s13 = sphi %s751_s13, %s989_s13   ;;  %s714_s12 = sphi %s749_s12, %s988_s12   ;;  %s710_s11 = sphi %s747_s11, %s987_s11   ;;  %s706_s10 = sphi %s745_s10, %s986_s10   ;;  %s702_s9 = sphi %s743_s9, %s985_s9  }
   0x9   : > { %s33_s17 = sadd.s32 1, %s718_s13  ;;  %s42_s18 = sadd.s32 1, %s710_s11 }
   0xa   : > { %p35_p0 = scmp.ge.s32.totalorder %s33_s17, 2  ;;  %p49_p1 = scmp.ne.s32.totalorder %s710_s11, %s706_s10 }
   0xb   : > { %p50_p2 = scmp.eq.s32.totalorder %s722_s14, 0  ;;  %p55_p3 = scmp.ne.s32.totalorder %s706_s10, %s702_s9 }
   0xc   : > { %s991_s17 = smov (%p35_p0, %s33_s17), 0  ;;  %p56_p5 = scmp.eq.s32.totalorder %s476_s15, 0 }
   0xd   : > { %p784_p4 = por %p50_p2, %p49_p1  ;;  %s37_s20 = ssub.s32 %s718_s13, %s991_s17 }
   0xe   : > { %p109_p6 = scmp.eq.s32.totalorder %s476_s15, 1  ;;  %p40_p7 = scmp.eq.s32.totalorder %s37_s20, 0 }
   0xf   : > { %p790_p8 = por %p56_p5, %p55_p3  ;;  %p115_p10 = scmp.eq.s32.totalorder %s477_s16, 1 }
  0x10   : > { %p794_p9 = por %p109_p6, %p49_p1  ;;  %p517_p13 = scmp.lt.s32.totalorder %s722_s14, 2 }
  0x11   : > { %s973_s21 = scalar_select %p790_p8, 1, 0 }
  0x12   : > { %s974_s22 = scalar_select %p794_p9, 1, 0 }
  0x13   : > { %s799_s23 = scalar_select %p40_p7, %s710_s11, %s42_s18  }
  0x14   : > { %p801_p11 = por %p115_p10, %p55_p3  ;;  %s808_s25 = sand.u32 1, %s710_s11  }
  0x15   : > { %s480_s26 = sshll.u32 %s808_s25, 3  ;;  %s497_s27 = sshll.u32 %s718_s13, 7 }
  0x16   : > { %s975_s24 = scalar_select %p801_p11, 1, 0 }
  0x17   : > { %s817_s30 = scalar_lea.hbm %s967_s0, %s497_s27  ;;  %s139_s3 = scalar_lea.vmem [#allocation2], %s480_s26 }
  0x18   : > { %s149_s4 = sshll.u32 %s139_s3, 4  ;;  %p825_p0 = pnand %p517_p13, %p784_p4  ;;  %s821_s4 = int_to_ptr.vmem [resolvable:$true] %s149_s4 }
  0x19   : > { %s136_s6 = scalar_lea.sflag [#allocation3], %s808_s25  ;;  %s576_s7 = scalar_lea.hbm %s817_s30, 128 }
  0x1a   : > { %p577_p3 = scmp.ne.s32.totalorder %s817_s30, %s576_s7  ;;  %p578_p5 = pneg %p825_p0 }
  0x1b   : > { %s581_s16 = scalar_lea.hbm %s967_s0, 256  ;;  %p582_p4 = scmp.lt.u32.totalorder %s817_s30, %s967_s0 }
  0x1c   : > { %p579_p6 = pnand %p578_p5, %p577_p3  ;;  %p583_p10 = scmp.lt.u32.totalorder %s581_s16, %s576_s7 }
  0x1d   : > { %p585_p12 = scmp.lt.u32.totalorder %s576_s7, %s817_s30 }
  0x1e   : > { %p580_p7 = pneg %p579_p6  ;;  %p584_p13 = por %p583_p10, %p582_p4 }
  0x20   : > { %p586_p1 = por %p585_p12, %p584_p13 }
  0x22   : > { %p587_p2 = pnand %p586_p1, %p580_p7 }
  0x24   : > { %590 = shalt.err (!%p587_p2)
}
  0x25   : > { %s591_s20 = scalar_lea.vmem %s821_s4, 128  ;;  %s724_s28 = smov [#allocation2]  }
  0x26   : > { %p592_p3 = scmp.ne.s32.totalorder %s821_s4, %s591_s20  ;;  %s596_s29 = sshll.u32 %s724_s28, 4  ;;  %s597_s29 = int_to_ptr.vmem [resolvable:$false] %s596_s29 }
  0x27   : > { %s598_s3 = scalar_lea.vmem %s597_s29, 256  ;;  %p599_p9 = scmp.lt.s32.totalorder %s821_s4, %s597_s29 }
  0x28   : > { %p594_p6 = pnand %p592_p3, %p578_p5  ;;  %p600_p4 = scmp.lt.s32.totalorder %s598_s3, %s591_s20 }
  0x2a   : > { %p595_p11 = pneg %p594_p6  ;;  %p601_p10 = por %p600_p4, %p599_p9 }
  0x2c   : > { %p602_p12 = pnand %p601_p10, %p595_p11 }
  0x2e   : > { %605 = shalt.err (!%p602_p12)
}
  0x2f   : > { %509 = dma.hbm_to_vmem [thread:$0]  (!%p825_p0), %s817_s30, 128, %s821_s4, %s136_s6  }
  0x30   : > { %p977_p1 = scmp.lt.s32.totalorder %s722_s14, 3  ;;  %p978_p2 = scmp.ge.s32.totalorder %s722_s14, 1 }
  0x31   : > { %s870_s16 = scalar_lea.hbm %s968_s1, %s497_s27  ;;  %s160_s18 = scalar_lea.vmem [#allocation5], %s480_s26 }
  0x32   : > { %p861_p7 = pnand %p978_p2, %p977_p1  ;;  %s170_s19 = sshll.u32 %s160_s18, 4  ;;  %s171_s19 = int_to_ptr.vmem [resolvable:$true] %s170_s19 }
  0x33   : > { %s157_s30 = scalar_lea.sflag [#allocation6], %s808_s25  ;;  %s606_s4 = scalar_lea.hbm %s870_s16, 128 }
  0x34   : > { %s979_s7 = scalar_select %p861_p7, 1, 0 }
  0x35   : > { %p607_p9 = scmp.ne.s32.totalorder %s870_s16, %s606_s4  ;;  %s611_s27 = scalar_lea.hbm %s968_s1, 256 }
  0x36   : > { %p612_p3 = scmp.lt.u32.totalorder %s870_s16, %s968_s1  ;;  %p613_p6 = scmp.lt.u32.totalorder %s611_s27, %s606_s4 }
  0x37   : > { %p609_p11 = pnand %p607_p9, %p578_p5  ;;  %p615_p10 = scmp.lt.u32.totalorder %s606_s4, %s870_s16 }
  0x38   : > { %p614_p4 = por %p613_p6, %p612_p3 }
  0x39   : > { %p610_p13 = pneg %p609_p11 }
  0x3a   : > { %p616_p12 = por %p615_p10, %p614_p4 }
  0x3c   : > { %p617_p1 = pnand %p616_p12, %p610_p13 }
  0x3e   : > { %620 = shalt.err (!%p617_p1)
}
  0x3f   : > { %s621_s25 = scalar_lea.vmem %s171_s19, 128  ;;  %s725_s26 = smov [#allocation5]  }
  0x40   : > { %p622_p2 = scmp.ne.s32.totalorder %s171_s19, %s621_s25  ;;  %s626_s3 = sshll.u32 %s725_s26, 4  ;;  %s627_s3 = int_to_ptr.vmem [resolvable:$false] %s626_s3 }
  0x41   : > { %s628_s8 = scalar_lea.vmem %s627_s3, 256  ;;  %p629_p8 = scmp.lt.s32.totalorder %s171_s19, %s627_s3 }
  0x42   : > { %p624_p9 = pnand %p622_p2, %p578_p5  ;;  %p630_p7 = scmp.lt.s32.totalorder %s628_s8, %s621_s25 }
  0x44   : > { %p625_p11 = pneg %p624_p9  ;;  %p631_p3 = por %p630_p7, %p629_p8 }
  0x46   : > { %p632_p6 = pnand %p631_p3, %p625_p11 }
  0x48   : > { %635 = shalt.err (!%p632_p6)
}
  0x49   : > { %512 = dma.hbm_to_vmem [thread:$0]  (!%p825_p0), %s870_s16, 128, %s171_s19, %s157_s30  }
  0x4a   : > { %p980_p13 = scmp.ne.s32.totalorder %s979_s7, 0 }
  0x4b   : > { %s897_s15 = sand.u32 (!%p980_p13), 1, %s706_s10   ;;  %p981_p5 = scmp.ne.s32.totalorder (!%p980_p13), %s973_s21, 0 }
  0x4c   : > { %179 = sbr.rel (%p980_p13) target bundleno = 174 (0xae), region = 28  ;;  %s487_s18 = sshll.u32 (!%p980_p13), %s897_s15, 3 }
  0x4d   : > { %s182_s4 = scalar_lea.sflag (!%p980_p13), [#allocation3], %s897_s15  ;;  %s185_s6 = scalar_lea.vmem (!%p980_p13), [#allocation2], %s487_s18 }
  0x53   : > { %689 = dma.done.wait (%p981_p5), %s182_s4, 128  }
  0x54   : > { %691 = vsyncadd (%p981_p5), %s182_s4, 4294967168  ;;  %s191_s5 = scalar_lea.sflag [#allocation6], %s897_s15  ;;  %s194_s16 = scalar_lea.vmem [#allocation5], %s487_s18 }
  0x55   : > { %693 = dma.done.wait (%p981_p5), %s191_s5, 128  }
  0x56   : > { %695 = vsyncadd (%p981_p5), %s191_s5, 4294967168  ;;  %v223_v0 = vld [vmem:[%s185_s6] sm:$0xff]  ;;  %v224_v1 = vld [vmem:[%s194_s16] sm:$0xff]  ;;  %vm229_vm0 = vcmask 1043456   ;;  %s489_s21 = sshll.u32 %s897_s15, 1  ;;  %s499_s30 = sshll.u32 %s714_s12, 5 }
  0x57   : > { %v225_v2 = vmul.f32 %v223_v0, %v223_v0  ;;  %v244_v3 = vmul.f32 %v224_v1, %v223_v0  ;;  %s219_s7 = scalar_lea.vmem [#allocation7], %s489_s21  ;;  %s920_s28 = scalar_lea.hbm %s969_s2, %s499_s30 }
  0x58   : > { %s366_s19 = sshll.u32 %s219_s7, 4  ;;  %s350_s29 = scalar_lea.sflag [#allocation4], %s897_s15  ;;  %s915_s19 = int_to_ptr.vmem [resolvable:$true] %s366_s19 }
  0x59   : > { %v227_v4 = vcombine.high %v225_v2, %v225_v2  ;;  %v230_v5 = vsel %vm229_vm0, %v225_v2, 0.0  ;;  %v246_v6 = vcombine.high %v244_v3, %v244_v3  ;;  %v248_v7 = vsel %vm229_vm0, %v244_v3, 0.0  ;;  %s636_s25 = scalar_lea.vmem %s915_s19, 32  ;;  %p982_p0 = scmp.ne.s32.totalorder %s974_s22, 0 }
  0x5a   : > { %v231_v8 = vrot.slane %v230_v5, 4  ;;  %v249_v9 = vrot.slane %v248_v7, 4  ;;  %p637_p8 = scmp.ne.s32.totalorder %s915_s19, %s636_s25  ;;  %s727_s12 = smov [#allocation7]  }
  0x5b   : > { %v237_v10 = vsel %vm229_vm0, %v227_v4, 0.0  ;;  %v255_v11 = vsel %vm229_vm0, %v246_v6, 0.0  ;;  %s640_s26 = sshll.u32 %s727_s12, 4  ;;  %s641_s26 = int_to_ptr.vmem [resolvable:$false] %s640_s26 }
  0x5c   : > { %v232_v12 = vadd.f32 %v231_v8, %v230_v5  ;;  %v238_v13 = vrot.slane %v237_v10, 4  ;;  %v256_v14 = vrot.slane %v255_v11, 4  ;;  %v250_v15 = vadd.f32 %v249_v9, %v248_v7  ;;  %p638_p7 = pnand %p637_p8, %p982_p0  ;;  %s642_s3 = scalar_lea.vmem %s641_s26, 64 }
  0x5d   : > { %p643_p10 = scmp.lt.s32.totalorder %s915_s19, %s641_s26  ;;  %p644_p12 = scmp.lt.s32.totalorder %s642_s3, %s636_s25 }
  0x5e   : > { %v233_v16 = vrot.slane %v232_v12, 2  ;;  %v239_v17 = vadd.f32 %v238_v13, %v237_v10  ;;  %v257_v18 = vadd.f32 %v256_v14, %v255_v11  ;;  %v251_v21 = vrot.slane %v250_v15, 2  ;;  %p639_p4 = pneg %p638_p7 }
  0x5f   : > { %p645_p1 = por %p644_p12, %p643_p10 }
  0x60   : > { %v234_v19 = vadd.f32 %v233_v16, %v232_v12  ;;  %v240_v20 = vrot.slane %v239_v17, 2  ;;  %v258_v24 = vrot.slane %v257_v18, 2  ;;  %v252_v27 = vadd.f32 %v251_v21, %v250_v15 }
  0x61   : > { %v726_v16 = vmov 1966171168   ;;  %p646_p2 = pnand %p645_p1, %p639_p4 }
  0x62   : > { %v235_v22 = vrot.slane %v234_v19, 1  ;;  %v241_v23 = vadd.f32 %v240_v20, %v239_v17  ;;  %v259_v29 = vadd.f32 %v258_v24, %v257_v18  ;;  %v253_v30 = vrot.slane %v252_v27, 1 }
  0x63   : > { %v330_v17 = vunpack.c.l.s4 %v726_v16  ;;  %v332_v18 = vlaneseq }
  0x64   : > { %v236_v25 = vadd.f32 %v235_v22, %v234_v19  ;;  %v242_v26 = vrot.slane %v241_v23, 1  ;;  %v260_v31 = vrot.slane %v259_v29, 1  ;;  %v254_v32 = vadd.f32 %v253_v30, %v252_v27 }
  0x65   : > { %v331_v24 = vunpack.c.0.s8 %v330_v17  ;;  %vm346_vm7 = vcmp.lt.s32.totalorder %v332_v18, 256 }
  0x66   : > { %v243_v28 = vadd.f32 %v242_v26, %v241_v23  ;;  %568 = vrsqrt.f32 %v236_v25  ;;  %v261_v33 = vadd.f32 %v260_v31, %v259_v29  ;;  %v333_v25 = vshrl.u32 %v332_v18, 7 }
  0x68   : > { %570 = vrsqrt.f32 %v243_v28  ;;  %v334_v30 = vsub.s32 %v331_v24, %v333_v25 }
  0x70   : > { %v569_v34 = vpop.eup %568 }
  0x71   : > { %v264_v35 = vmul.f32 %v569_v34, %v254_v32 }
  0x72   : > { %v571_v36 = vpop.eup %570 }
  0x73   : > { %v910_v37 = vmul.f32 %v571_v36, %v261_v33  ;;  %v490_v38 = vclamps-f32 %v264_v35, 0.9999999 }
  0x75   : > { %v491_v39 = vclamps-f32 %v910_v37, 0.9999999  ;;  %v270_v40 = vand.u32 2147483647, %v490_v38  ;;  %vm320_vm5 = vcmp.ge.f32.partialorder %v490_v38, 0.0 }
  0x77   : > { %v271_v41 = vand.u32 2147483647, %v491_v39  ;;  %v272_v42 = vmul.f32 -0.0012624911, %v270_v40  ;;  %v300_v43 = vsub.f32 1.0, %v270_v40  ;;  %vm321_vm6 = vcmp.ge.f32.partialorder %v491_v39, 0.0 }
  0x79   : > { %v273_v44 = vmul.f32 -0.0012624911, %v271_v41  ;;  %v274_v45 = vadd.f32 0.00667009, %v272_v42  ;;  %v301_v46 = vsub.f32 1.0, %v271_v41  ;;  %v302_v47 = vmax.f32 %v300_v43, 0.0 }
  0x7b   : > { %v275_v48 = vadd.f32 0.00667009, %v273_v44  ;;  %v276_v49 = vmul.f32 %v274_v45, %v270_v40  ;;  %v303_v50 = vmax.f32 %v301_v46, 0.0  ;;  %572 = vrsqrt.f32 %v302_v47 }
  0x7c   : > { %vm306_vm1 = vcmp.eq.f32.partialorder %v302_v47, inf  ;;  %v309_v7 = vand.u32 2147483648, %v302_v47  ;;  %vm308_vm3 = vcmp.eq.f32.partialorder %v302_v47, 0.0 }
  0x7d   : > { %v277_v51 = vmul.f32 %v275_v48, %v271_v41  ;;  %v278_v52 = vadd.f32 -0.017088126, %v276_v49  ;;  %574 = vrsqrt.f32 %v303_v50  ;;  %vm313_vm2 = vcmp.eq.f32.partialorder %v303_v50, inf }
  0x7e   : > { %v316_v11 = vand.u32 2147483648, %v303_v50  ;;  %vm315_vm4 = vcmp.eq.f32.partialorder %v303_v50, 0.0 }
  0x7f   : > { %v279_v53 = vadd.f32 -0.017088126, %v277_v51  ;;  %v280_v54 = vmul.f32 %v278_v52, %v270_v40 }
  0x81   : > { %v281_v55 = vmul.f32 %v279_v53, %v271_v41  ;;  %v282_v56 = vadd.f32 0.03089188, %v280_v54 }
  0x83   : > { %v283_v57 = vadd.f32 0.03089188, %v281_v55  ;;  %v284_v58 = vmul.f32 %v282_v56, %v270_v40 }
  0x85   : > { %v285_v59 = vmul.f32 %v283_v57, %v271_v41  ;;  %v286_v60 = vadd.f32 -0.050174303, %v284_v58  ;;  %v573_v61 = vpop.eup %572 }
  0x86   : > { %v305_v3 = vmul.f32 %v573_v61, %v302_v47 }
  0x87   : > { %v287_v62 = vadd.f32 -0.050174303, %v285_v59  ;;  %v288_v63 = vmul.f32 %v286_v60, %v270_v40  ;;  %v575_v0 = vpop.eup %574 }
  0x88   : > { %v312_v6 = vmul.f32 %v575_v0, %v303_v50  ;;  %v307_v10 = vsel %vm306_vm1, %v302_v47, %v305_v3 }
  0x89   : > { %v289_v1 = vmul.f32 %v287_v62, %v271_v41  ;;  %v290_v2 = vadd.f32 0.08897899, %v288_v63  ;;  %v310_v15 = vsel %vm308_vm3, %v309_v7, %v307_v10 }
  0x8a   : > { %v314_v14 = vsel %vm313_vm2, %v303_v50, %v312_v6 }
  0x8b   : > { %v291_v4 = vadd.f32 0.08897899, %v289_v1  ;;  %v292_v5 = vmul.f32 %v290_v2, %v270_v40  ;;  %v317_v21 = vsel %vm315_vm4, %v316_v11, %v314_v14 }
  0x8d   : > { %v293_v8 = vmul.f32 %v291_v4, %v271_v41  ;;  %v294_v9 = vadd.f32 -0.2145988, %v292_v5 }
  0x8f   : > { %v295_v12 = vadd.f32 -0.2145988, %v293_v8  ;;  %v296_v13 = vmul.f32 %v294_v9, %v270_v40 }
  0x91   : > { %v297_v19 = vmul.f32 %v295_v12, %v271_v41  ;;  %v298_v20 = vadd.f32 1.5707963, %v296_v13 }
  0x93   : > { %v299_v22 = vadd.f32 1.5707963, %v297_v19  ;;  %v318_v23 = vmul.f32 %v310_v15, %v298_v20 }
  0x95   : > { %v319_v26 = vmul.f32 %v317_v21, %v299_v22  ;;  %v322_v27 = vsub.f32 3.1415927, %v318_v23 }
  0x97   : > { %v323_v28 = vsub.f32 3.1415927, %v319_v26  ;;  %v324_v29 = vsel %vm320_vm5, %v318_v23, %v322_v27 }
  0x99   : > { %v325_v31 = vsel %vm321_vm6, %v319_v26, %v323_v28 }
  0x9a   : > { %v328_v32 = vcombine.low %v324_v29, %v325_v31 }
  0x9c   : > { %v335_v33 = vrot.slane %v328_v32, %v334_v30 }
  0x9e   : > { %v342_v34 = vrot.slane %v335_v33, %v334_v30 }
  0xa0   : > { %348 = vst.msk [vmem:[%s219_s7] sm:$0x3] %vm346_vm7, %v342_v34 }
  0xa1   : > { %649 = shalt.err (!%p646_p2)
}
  0xa2   : > { %s650_s8 = scalar_lea.hbm %s920_s28, 32  ;;  %s654_s4 = scalar_lea.hbm %s969_s2, 64 }
  0xa3   : > { %p651_p9 = scmp.ne.s32.totalorder %s920_s28, %s650_s8  ;;  %p655_p6 = scmp.lt.u32.totalorder %s920_s28, %s969_s2 }
  0xa4   : > { %p656_p13 = scmp.lt.u32.totalorder %s654_s4, %s650_s8  ;;  %p658_p8 = scmp.lt.u32.totalorder %s650_s8, %s920_s28 }
  0xa5   : > { %p652_p11 = pnand %p651_p9, %p982_p0 }
  0xa6   : > { %p657_p5 = por %p656_p13, %p655_p6 }
  0xa7   : > { %p653_p3 = pneg %p652_p11 }
  0xa8   : > { %p659_p7 = por %p658_p8, %p657_p5 }
  0xaa   : > { %p660_p4 = pnand %p659_p7, %p653_p3 }
  0xac   : > { %663 = shalt.err (!%p660_p4)
}
  0xad   : > { %504 = dma.vmem_to_hbm [thread:$0]  (%p982_p0), %s915_s19, 32, %s920_s28, %s350_s29  }
  0xae PF: > { %s378_s16 = sand.u32 1, %s702_s9   ;;  %p983_p10 = scmp.ne.s32.totalorder %s975_s24, 0 }
  0xaf   : > { %p984_p12 = scmp.ge.s32.totalorder %s722_s14, 2  ;;  %s379_s21 = scalar_lea.sflag [#allocation4], %s378_s16 }
  0xb1   : > { %p514_p1 = pnand %p984_p12, %p983_p10 }
  0xb3   : > { %697 = dma.done.wait (!%p514_p1), %s379_s21, 32  }
  0xb4   : > { %699 = vsyncadd (!%p514_p1), %s379_s21, 4294967264  ;;  %s21_s14 = sadd.s32 1, %s722_s14   ;;  %s985_s9 = smov %s706_s10 }
  0xb5   : > { %p18_p2 = scmp.ge.s32.totalorder %s21_s14, 4   ;;  %s986_s10 = smov %s710_s11 }
  0xb6   : > { %s987_s11 = smov %s799_s23  ;;  %s988_s12 = smov %s718_s13 }
  0xb7   : > { %s989_s13 = smov %s991_s17  ;;  %20 = sbr.rel (!%p18_p2) target bundleno = 8 (0x8), region = 86 }
  0xbe   :  { %384 = vsyncpa [#allocation3], 1 }
  0xbf   :  { %386 = vsyncpa [#allocation3 + $0x1], 1 }
  0xc0   :  { %387 = vsyncpa [#allocation6], 1 }
  0xc1   :  { %389 = vsyncpa [#allocation6 + $0x1], 1 }
  0xc2   :  { %390 = vsyncpa [#allocation4], 1 }
  0xc3   :  { %392 = vsyncpa [#allocation4 + $0x1], 1 }

</bundles_post_ra>
